<compile_context>
chip_gen: v6e
topology: v6e:2x2x1
jax: 0.10.0
libtpu: 0.0.40
codegen_flags: <defaults>
</compile_context>

<pallas_src>
import jax
import jax.numpy as jnp
from jax.experimental import pallas as pl
from jax.experimental.pallas import tpu as pltpu


def _round_up(x, m):
    return (x + m - 1) // m * m


def _pick_tm(M, tm_req):
    """Row tile: multiple of 16 (bf16 sublane packing), multiple of 256 (MXU
    height on v6e/v7x) for large tiles, and >= 2 row tiles when M allows so the
    'parallel' row axis can split across v7x's two TensorCores."""
    tm = max(16, min(tm_req, _round_up(M, 16)))
    tm = (tm // 256) * 256 if tm >= 256 else _round_up(tm, 16)
    if M > 256 and M <= tm:
        tm = _round_up(pl.cdiv(M, 2), 256)
    return tm


def _pick_tv(V, tv_req):
    """Largest lane-aligned (multiple of 128) vocab tile <= tv_req dividing V."""
    tv = max(128, min((tv_req // 128) * 128, V))
    while V % tv != 0:
        tv -= 128
    return tv


def _mlm_single_pass_kernel(x_ref, w_ref, b_ref, o_ref, m_scr, l_scr):
    # x_ref : (tm, H)  bf16   activations (resident across the vocab sweep)
    # w_ref : (H, tv)  bf16   streamed weight vocab tile (double buffered)
    # b_ref : (1, tv)  f32    bias vocab tile
    # o_ref : (tm, V)  f32    resident output block (logits, then log-probs)
    # m_scr : (tm, 1)  f32    running row max      (online logsumexp)
    # l_scr : (tm, 1)  f32    running row sum(exp) (online logsumexp)
    j = pl.program_id(1)
    nj = pl.num_programs(1)
    tv = w_ref.shape[1]

    # bf16 x bf16 -> f32 on the MXU.
    logits = jnp.dot(x_ref[...], w_ref[...],
                     preferred_element_type=jnp.float32) + b_ref[...]

    @pl.when(j == 0)
    def _init():
        m_scr[...] = jnp.full(m_scr.shape, -jnp.inf, m_scr.dtype)
        l_scr[...] = jnp.zeros(l_scr.shape, l_scr.dtype)

    m_prev = m_scr[...]
    m_new = jnp.maximum(m_prev, jnp.max(logits, axis=-1, keepdims=True))
    l_scr[...] = (l_scr[...] * jnp.exp(m_prev - m_new)
                  + jnp.sum(jnp.exp(logits - m_new), axis=-1, keepdims=True))
    m_scr[...] = m_new

    # Stash unnormalized logits into the resident output block (lane-aligned slice).
    o_ref[:, pl.ds(pl.multiple_of(j * tv, 128), tv)] = logits

    @pl.when(j == nj - 1)
    def _finalize():
        lse = m_scr[...] + jnp.log(l_scr[...])
        o_ref[...] = o_ref[...] - lse


def _mlm_two_pass_kernel(x_ref, w_ref, b_ref, o_ref, m_scr, l_scr):
    # Fallback when a resident (tm, V) output block would not fit VMEM.
    # p == 0: accumulate logsumexp stats; p == 1: recompute logits, write tiles.
    p = pl.program_id(1)
    j = pl.program_id(2)

    logits = jnp.dot(x_ref[...], w_ref[...],
                     preferred_element_type=jnp.float32) + b_ref[...]

    @pl.when(jnp.logical_and(p == 0, j == 0))
    def _init():
        m_scr[...] = jnp.full(m_scr.shape, -jnp.inf, m_scr.dtype)
        l_scr[...] = jnp.zeros(l_scr.shape, l_scr.dtype)

    @pl.when(p == 0)
    def _stats():
        m_prev = m_scr[...]
        m_new = jnp.maximum(m_prev, jnp.max(logits, axis=-1, keepdims=True))
        l_scr[...] = (l_scr[...] * jnp.exp(m_prev - m_new)
                      + jnp.sum(jnp.exp(logits - m_new), axis=-1, keepdims=True))
        m_scr[...] = m_new

    @pl.when(jnp.logical_and(p == 1, j == 0))
    def _fold_lse():
        # Reuse m_scr as the per-row logsumexp for the whole write pass
        # (computed once per row tile, not once per vocab tile).
        m_scr[...] = m_scr[...] + jnp.log(l_scr[...])

    @pl.when(p == 1)
    def _write():
        o_ref[...] = (logits - m_scr[...]).astype(o_ref.dtype)


def masked_language_model(x, w_t, b, *, tm=512, tv=2048):
    """LogSoftmax(x @ w_t + b, axis=-1).

    x   : (B, S, H) activations (f32 or bf16)
    w_t : (H, V)    linear weight, stored transposed (PyTorch keeps (V, H));
                    pass it pre-cast to bf16 to avoid a per-call HBM cast pass.
    b   : (V,)      bias
    returns (B, S, V) float32 log-probabilities
    """
    B, S, H = x.shape
    V = w_t.shape[1]
    assert w_t.shape[0] == H and b.shape == (V,)
    assert V % 128 == 0, "vocab must be lane aligned (multiple of 128)"
    # TODO(synk): pad the vocab axis (bias -> -inf, mask padded lanes out of the
    # max/sum) if V is ever not a multiple of 128.

    M = B * S
    x2 = x.reshape(M, H)
    if x2.dtype != jnp.bfloat16:
        x2 = x2.astype(jnp.bfloat16)
    wb = w_t if w_t.dtype == jnp.bfloat16 else w_t.astype(jnp.bfloat16)
    b2 = b.reshape(1, V).astype(jnp.float32)

    tm = _pick_tm(M, tm)
    tv = _pick_tv(V, tv)

    # VMEM budget: 75% of capacity (≈48 MiB on v7x's 64 MiB, ≈96 MiB on v5e/v6e).
    try:
        info = pltpu.get_tpu_info()
        vmem_cap = int(getattr(info, "vmem_capacity_bytes", 64 << 20))
    except Exception:  # pragma: no cover - conservative fallback
        vmem_cap = 64 << 20
    budget = min((vmem_cap * 3) // 4, 96 << 20)
    margin = 4 << 20

    def est_bytes(tm_, tv_, out_cols):
        # Double-buffered x / w / bias / output tiles + scratch (counted once).
        return (2 * tm_ * H * 2          # x tile (bf16)
                + 2 * H * tv_ * 2        # weight vocab tile (bf16)
                + 2 * tv_ * 4            # bias vocab tile
                + 2 * tm_ * out_cols * 4  # output block
                + 2 * tm_ * 4            # m / l scratch
                + (64 << 10))            # slack

    single_pass = est_bytes(tm, tv, V) + margin <= budget

    if single_pass:
        nj = V // tv
        vmem_limit = int(min(max(est_bytes(tm, tv, V) + margin, 16 << 20), budget))
        out = pl.pallas_call(
            _mlm_single_pass_kernel,
            out_shape=jax.ShapeDtypeStruct((M, V), jnp.float32),
            grid_spec=pltpu.PrefetchScalarGridSpec(
                num_scalar_prefetch=0,
                grid=(pl.cdiv(M, tm), nj),
                in_specs=[
                    # activations: resident for the whole vocab sweep
                    pl.BlockSpec((tm, H), lambda i, j: (i, 0)),
                    # weight vocab tile: streamed along j
                    pl.BlockSpec((H, tv), lambda i, j: (0, j)),
                    # bias vocab tile
                    pl.BlockSpec((1, tv), lambda i, j: (0, j)),
                ],
                # Resident output block; flushed once per row tile with final data.
                out_specs=pl.BlockSpec((tm, V), lambda i, j: (i, 0)),
                scratch_shapes=[
                    pltpu.VMEM((tm, 1), jnp.float32),   # running max
                    pltpu.VMEM((tm, 1), jnp.float32),   # running sum(exp)
                ],
            ),
            compiler_params=pltpu.CompilerParams(
                dimension_semantics=("parallel", "arbitrary"),
                vmem_limit_bytes=vmem_limit,
            ),
        )(x2, wb, b2)
    else:
        # Shrink tiles until the streaming two-pass footprint fits the budget.
        while est_bytes(tm, tv, tv) + margin > budget and tv > 128:
            tv = _pick_tv(V, tv // 2)
        while est_bytes(tm, tv, tv) + margin > budget and tm > 16:
            tm = _pick_tm(M, tm // 2)
        nj = V // tv
        vmem_limit = int(min(max(est_bytes(tm, tv, tv) + margin, 16 << 20), budget))
        out = pl.pallas_call(
            _mlm_two_pass_kernel,
            out_shape=jax.ShapeDtypeStruct((M, V), jnp.float32),
            grid_spec=pltpu.PrefetchScalarGridSpec(
                num_scalar_prefetch=0,
                grid=(pl.cdiv(M, tm), 2, nj),
                in_specs=[
                    pl.BlockSpec((tm, H), lambda i, p, j: (i, 0)),
                    pl.BlockSpec((H, tv), lambda i, p, j: (0, j)),
                    pl.BlockSpec((1, tv), lambda i, p, j: (0, j)),
                ],
                # Pass 0 (p == 0) writes nothing: the output index is pinned to
                # (i, 0) so no garbage write-backs happen; pass 1 walks the vocab
                # tiles.  Every output block hits HBM exactly once, with final data.
                out_specs=pl.BlockSpec((tm, tv), lambda i, p, j: (i, j * p)),
                scratch_shapes=[
                    pltpu.VMEM((tm, 1), jnp.float32),   # running max / lse
                    pltpu.VMEM((tm, 1), jnp.float32),   # running sum(exp)
                ],
            ),
            compiler_params=pltpu.CompilerParams(
                dimension_semantics=("parallel", "arbitrary", "arbitrary"),
                vmem_limit_bytes=vmem_limit,
            ),
        )(x2, wb, b2)

    return out.reshape(B, S, V)


if __name__ == "__main__":
    # Small shapes consistent with the module: batch=2, seq=8, hidden=32, vocab=512
    B, S, H, V = 2, 8, 32, 512

    key = jax.random.PRNGKey(0)
    kx, kw, kb = jax.random.split(key, 3)

    x = jax.random.normal(kx, (B, S, H), dtype=jnp.float32)
    # Linear params (PyTorch stores weight as (V, H); kernel keeps it transposed).
    bound = 1.0 / (H ** 0.5)
    w_t = jax.random.uniform(kw, (H, V), dtype=jnp.float32, minval=-bound, maxval=bound)
    b = jax.random.uniform(kb, (V,), dtype=jnp.float32, minval=-bound, maxval=bound)

    # Hoisted one-time bf16 weight cast (avoid a per-call HBM cast pass).
    w_bf16 = w_t.astype(jnp.bfloat16)

    out = masked_language_model(x, w_bf16, b)
    out = jax.block_until_ready(out)
    assert out.shape == (B, S, V)

    # Correctness: reference with the same bf16-quantized matmul inputs
    # (MXU consumes bf16, accumulates f32), so tolerances stay tight.
    xb = x.astype(jnp.bfloat16).astype(jnp.float32)
    wf = w_bf16.astype(jnp.float32)
    ref = jax.nn.log_softmax(jnp.einsum("bsh,hv->bsv", xb, wf) + b, axis=-1)
    assert jnp.allclose(out, ref, atol=2e-3, rtol=2e-3), "mismatch vs reference"
    # Log-probs should normalize.
    assert jnp.allclose(jnp.sum(jnp.exp(out), axis=-1), 1.0, atol=1e-3)

    print("KERNEL_OK")
</pallas_src>

<mosaic_0001>
module attributes {stable_mosaic.version = 11 : i64} {
  func.func @_mlm_single_pass_kernel(%arg0: i32, %arg1: i32, %arg2: memref<16x32xbf16, #tpu.memory_space<vmem>>, %arg3: memref<32x512xbf16, #tpu.memory_space<vmem>>, %arg4: memref<1x512xf32, #tpu.memory_space<vmem>>, %arg5: memref<16x512xf32, #tpu.memory_space<vmem>>, %arg6: memref<16x1xf32, #tpu.memory_space<vmem>>, %arg7: memref<16x1xf32, #tpu.memory_space<vmem>>) attributes {dimension_semantics = [#tpu.dimension_semantics<parallel>, #tpu.dimension_semantics<arbitrary>], iteration_bounds = array<i64: 1, 1>, scalar_prefetch = 0 : i64, scratch_operands = 2 : i64, tpu.core_type = #tpu.core_type<tc>, window_params = [{transform_indices = @transform_0, window_bounds = array<i64: 16, 32>}, {transform_indices = @transform_1, window_bounds = array<i64: 32, 512>}, {transform_indices = @transform_2, window_bounds = array<i64: 1, 512>}, {transform_indices = @transform_3, window_bounds = array<i64: 16, 512>}]} {
    %c0 = arith.constant 0 : index
    %c0_0 = arith.constant 0 : index
    %0 = vector.load %arg2[%c0, %c0_0] : memref<16x32xbf16, #tpu.memory_space<vmem>>, vector<16x32xbf16>
    %c0_1 = arith.constant 0 : index
    %c0_2 = arith.constant 0 : index
    %1 = vector.load %arg3[%c0_1, %c0_2] : memref<32x512xbf16, #tpu.memory_space<vmem>>, vector<32x512xbf16>
    %cst = arith.constant dense<0.000000e+00> : vector<16x512xf32>
    %2 = tpu.matmul %0, %1, %cst {dimension_numbers = #tpu.dot_dimension_numbers<[1], [0], [0], [1], [0, 0, 1, 1], [], []>} : vector<16x32xbf16>, vector<32x512xbf16>, vector<16x512xf32> -> vector<16x512xf32>
    %c0_3 = arith.constant 0 : index
    %c0_4 = arith.constant 0 : index
    %3 = vector.load %arg4[%c0_3, %c0_4] : memref<1x512xf32, #tpu.memory_space<vmem>>, vector<1x512xf32>
    %4 = vector.broadcast %3 : vector<1x512xf32> to vector<16x512xf32>
    %5 = arith.addf %2, %4 : vector<16x512xf32>
    %c0_i32 = arith.constant 0 : i32
    %6 = arith.cmpi eq, %arg1, %c0_i32 : i32
    %7 = arith.extui %6 : i1 to i32
    %c0_i32_5 = arith.constant 0 : i32
    %8 = arith.cmpi ne, %7, %c0_i32_5 : i32
    scf.if %8 {
      %cst_19 = arith.constant 0xFF800000 : f32
      %32 = vector.broadcast %cst_19 : f32 to vector<16x1xf32>
      %c0_20 = arith.constant 0 : index
      %c0_21 = arith.constant 0 : index
      %33 = vector.load %arg6[%c0_20, %c0_21] : memref<16x1xf32, #tpu.memory_space<vmem>>, vector<16x1xf32>
      tpu.vector_store %arg6[%c0_20, %c0_21], %32 {strides = array<i32>} : memref<16x1xf32, #tpu.memory_space<vmem>>, vector<16x1xf32>,
      %cst_22 = arith.constant 0.000000e+00 : f32
      %34 = vector.broadcast %cst_22 : f32 to vector<16x1xf32>
      %c0_23 = arith.constant 0 : index
      %c0_24 = arith.constant 0 : index
      %35 = vector.load %arg7[%c0_23, %c0_24] : memref<16x1xf32, #tpu.memory_space<vmem>>, vector<16x1xf32>
      tpu.vector_store %arg7[%c0_23, %c0_24], %34 {strides = array<i32>} : memref<16x1xf32, #tpu.memory_space<vmem>>, vector<16x1xf32>,
    } else {
    }
    %c0_6 = arith.constant 0 : index
    %c0_7 = arith.constant 0 : index
    %9 = vector.load %arg6[%c0_6, %c0_7] : memref<16x1xf32, #tpu.memory_space<vmem>>, vector<16x1xf32>
    %cst_8 = arith.constant dense<0xFF800000> : vector<16xf32>
    %10 = vector.multi_reduction <maximumf>, %5, %cst_8 [1] : vector<16x512xf32> to vector<16xf32>
    %11 = vector.shape_cast %10 : vector<16xf32> to vector<16x1xf32>
    %12 = arith.maximumf %9, %11 : vector<16x1xf32>
    %c0_9 = arith.constant 0 : index
    %c0_10 = arith.constant 0 : index
    %13 = vector.load %arg7[%c0_9, %c0_10] : memref<16x1xf32, #tpu.memory_space<vmem>>, vector<16x1xf32>
    %14 = arith.subf %9, %12 : vector<16x1xf32>
    %15 = math.exp %14 : vector<16x1xf32>
    %16 = arith.mulf %13, %15 : vector<16x1xf32>
    %17 = vector.broadcast %12 : vector<16x1xf32> to vector<16x512xf32>
    %18 = arith.subf %5, %17 : vector<16x512xf32>
    %19 = math.exp %18 : vector<16x512xf32>
    %cst_11 = arith.constant dense<0.000000e+00> : vector<16xf32>
    %20 = vector.multi_reduction <add>, %19, %cst_11 [1] : vector<16x512xf32> to vector<16xf32>
    %21 = vector.shape_cast %20 : vector<16xf32> to vector<16x1xf32>
    %22 = arith.addf %16, %21 : vector<16x1xf32>
    %c0_12 = arith.constant 0 : index
    %c0_13 = arith.constant 0 : index
    %23 = vector.load %arg7[%c0_12, %c0_13] : memref<16x1xf32, #tpu.memory_space<vmem>>, vector<16x1xf32>
    tpu.vector_store %arg7[%c0_12, %c0_13], %22 {strides = array<i32>} : memref<16x1xf32, #tpu.memory_space<vmem>>, vector<16x1xf32>,
    %c0_14 = arith.constant 0 : index
    %c0_15 = arith.constant 0 : index
    %24 = vector.load %arg6[%c0_14, %c0_15] : memref<16x1xf32, #tpu.memory_space<vmem>>, vector<16x1xf32>
    tpu.vector_store %arg6[%c0_14, %c0_15], %12 {strides = array<i32>} : memref<16x1xf32, #tpu.memory_space<vmem>>, vector<16x1xf32>,
    %c512_i32 = arith.constant 512 : i32
    %25 = arith.muli %arg1, %c512_i32 : i32
    %26 = tpu.assume_multiple %25, 128 : i32
    %c0_16 = arith.constant 0 : index
    %27 = arith.index_cast %26 : i32 to index
    %28 = vector.load %arg5[%c0_16, %27] : memref<16x512xf32, #tpu.memory_space<vmem>>, vector<16x512xf32>
    tpu.vector_store %arg5[%c0_16, %27], %5 {strides = array<i32>} : memref<16x512xf32, #tpu.memory_space<vmem>>, vector<16x512xf32>,
    %c0_i32_17 = arith.constant 0 : i32
    %29 = arith.cmpi eq, %arg1, %c0_i32_17 : i32
    %30 = arith.extui %29 : i1 to i32
    %c0_i32_18 = arith.constant 0 : i32
    %31 = arith.cmpi ne, %30, %c0_i32_18 : i32
    scf.if %31 {
      %c0_19 = arith.constant 0 : index
      %c0_20 = arith.constant 0 : index
      %32 = vector.load %arg6[%c0_19, %c0_20] : memref<16x1xf32, #tpu.memory_space<vmem>>, vector<16x1xf32>
      %c0_21 = arith.constant 0 : index
      %c0_22 = arith.constant 0 : index
      %33 = vector.load %arg7[%c0_21, %c0_22] : memref<16x1xf32, #tpu.memory_space<vmem>>, vector<16x1xf32>
      %34 = math.log %33 : vector<16x1xf32>
      %35 = arith.addf %32, %34 : vector<16x1xf32>
      %c0_23 = arith.constant 0 : index
      %c0_24 = arith.constant 0 : index
      %36 = vector.load %arg5[%c0_23, %c0_24] : memref<16x512xf32, #tpu.memory_space<vmem>>, vector<16x512xf32>
      %37 = vector.broadcast %35 : vector<16x1xf32> to vector<16x512xf32>
      %38 = arith.subf %36, %37 : vector<16x512xf32>
      %c0_25 = arith.constant 0 : index
      %c0_26 = arith.constant 0 : index
      %39 = vector.load %arg5[%c0_25, %c0_26] : memref<16x512xf32, #tpu.memory_space<vmem>>, vector<16x512xf32>
      tpu.vector_store %arg5[%c0_25, %c0_26], %38 {strides = array<i32>} : memref<16x512xf32, #tpu.memory_space<vmem>>, vector<16x512xf32>,
    } else {
    }
    return
  }
  func.func @transform_0(%arg0: i32, %arg1: i32) -> (i32, i32) {
    %c0_i32 = arith.constant 0 : i32
    %c0_i32_0 = arith.constant 0 : i32
    return %arg0, %c0_i32 : i32, i32
  }
  func.func @transform_1(%arg0: i32, %arg1: i32) -> (i32, i32) {
    %c0_i32 = arith.constant 0 : i32
    %c0_i32_0 = arith.constant 0 : i32
    return %c0_i32, %arg1 : i32, i32
  }
  func.func @transform_2(%arg0: i32, %arg1: i32) -> (i32, i32) {
    %c0_i32 = arith.constant 0 : i32
    %c0_i32_0 = arith.constant 0 : i32
    return %c0_i32, %arg1 : i32, i32
  }
  func.func @transform_3(%arg0: i32, %arg1: i32) -> (i32, i32) {
    %c0_i32 = arith.constant 0 : i32
    %c0_i32_0 = arith.constant 0 : i32
    return %arg0, %c0_i32 : i32, i32
  }
}

</mosaic_0001>

<bundles_post_ra>
// kernel: tpu_custom_call.1
= control target key start
LH: loop header
LB: loop body
LE: loop exit
PB: predicated region body
PF: predicated region fallthrough
CT: control target
= control target key end

     0   :  { %8 = vsyncpa [#allocation5], 0  ;;  %s628_s0 = inlined_call_operand.hbm [shape: bf16[16,32], index: 0, kind: input, shape index: {}]   ;;  %s629_s1 = inlined_call_operand.hbm [shape: bf16[32,512], index: 1, kind: input, shape index: {}]   ;;  %s630_s2 = inlined_call_operand.hbm [shape: f32[1,512], index: 2, kind: input, shape index: {}]   ;;  %s631_s3 = inlined_call_operand.hbm [shape: f32[16,512], index: 3, kind: output, shape index: {}]  }
   0x1   :  { %9 = vsyncpa [#allocation8], 0 }
   0x2   :  { %10 = vsyncpa [#allocation6], 0  ;;  %s535_s12 = smov [#allocation7]  }
   0x3   :  { %s28_s13 = sshll.u32 %s535_s12, 4  ;;  %s29_s13 = int_to_ptr.vmem [resolvable:$true] %s28_s13 }
   0x4   :  { %s457_s14 = scalar_lea.vmem %s29_s13, 1024  ;;  %p462_p1 = scmp.lt.s32.totalorder %s29_s13, %s29_s13 }
   0x5   :  { %p458_p0 = scmp.ne.s32.totalorder %s29_s13, %s457_s14  ;;  %p463_p2 = scmp.lt.s32.totalorder %s457_s14, %s457_s14 }
   0x7   :  { %p464_p3 = por %p463_p2, %p462_p1 }
   0x9   :  { %p465_p4 = pnand %p464_p3, %p458_p0 }
   0xb   :  { %468 = shalt.err (!%p465_p4)
}
   0xc   :  { %s536_s15 = smov 256   ;;  %s537_s16 = smov 16  }
   0xd   :  { %34 = dma.hbm_to_vmem [thread:$0]  %s629_s1, 1024, %s29_s13, [#allocation8], %s536_s15, %s536_s15, %s537_s16  }
   0xe   :  { %s538_s19 = smov [#allocation4]  }
   0xf   :  { %s16_s20 = sshll.u32 %s538_s19, 4  ;;  %s17_s20 = int_to_ptr.vmem [resolvable:$true] %s16_s20 }
  0x10   :  { %s477_s21 = scalar_lea.vmem %s17_s20, 128  ;;  %p482_p6 = scmp.lt.s32.totalorder %s17_s20, %s17_s20 }
  0x11   :  { %p478_p5 = scmp.ne.s32.totalorder %s17_s20, %s477_s21  ;;  %p483_p7 = scmp.lt.s32.totalorder %s477_s21, %s477_s21 }
  0x13   :  { %p484_p8 = por %p483_p7, %p482_p6 }
  0x15   :  { %p485_p9 = pnand %p484_p8, %p478_p5 }
  0x17   :  { %488 = shalt.err (!%p485_p9)
}
  0x18   :  { %s539_s22 = smov 64   ;;  %s540_s23 = smov 4  }
  0x19   :  { %22 = dma.hbm_to_vmem [thread:$0]  %s628_s0, 128, %s17_s20, [#allocation5], %s539_s22, %s539_s22, %s540_s23  }
  0x1a   :  { %s541_s26 = smov [#allocation9]  }
  0x1b   :  { %s41_s27 = sshll.u32 %s541_s26, 4  ;;  %s42_s27 = int_to_ptr.vmem [resolvable:$true] %s41_s27 }
  0x1c   :  { %s497_s1 = scalar_lea.vmem %s42_s27, 64  ;;  %p502_p11 = scmp.lt.s32.totalorder %s42_s27, %s42_s27 }
  0x1d   :  { %p498_p10 = scmp.ne.s32.totalorder %s42_s27, %s497_s1  ;;  %p503_p12 = scmp.lt.s32.totalorder %s497_s1, %s497_s1 }
  0x1f   :  { %p504_p13 = por %p503_p12, %p502_p11 }
  0x21   :  { %p505_p0 = pnand %p504_p13, %p498_p10 }
  0x23   :  { %508 = shalt.err (!%p505_p0)
}
  0x24   :  { %44 = dma.hbm_to_vmem [thread:$0]  %s630_s2, 64, %s42_s27, [#allocation8]  }
  0x25   :  { %529 = dma.done.wait [#allocation5], 128  }
  0x26   :  { %530 = vsyncadd [#allocation5], 4294967168 }
  0x27   :  { %531 = dma.done.wait [#allocation8], 1088  }
  0x28   :  { %532 = vsyncadd [#allocation8], 4294966208  ;;  %v542_v0 = vmov 0   ;;  %v412_v1 = vld [vmem:[#allocation7 + $0x24] ss:$16 sps:$4 sm:$0xff]   ;;  %v424_v9 = vld [vmem:[#allocation4] sm:$0xff]   ;;  %v67_v11 = vlaneseq }
  0x29   :  { %168 = vmatprep.mubr.bf16.mxu0 %v542_v0  ;;  %211 = vmatprep.mubr.bf16.mxu1 %v542_v0  ;;  %v414_v2 = vld [vmem:[#allocation7 + $0x2c] ss:$16 sps:$4 sm:$0xff]   ;;  %v416_v3 = vld [vmem:[#allocation7 + $0x20] ss:$16 sps:$4 sm:$0xff]   ;;  %v417_v4 = vld [vmem:[#allocation7 + $0x28] ss:$16 sps:$4 sm:$0xff]  }
  0x2a   :  { %410 = vset.pattern.permute.xlu1 %v542_v0  ;;  %411 = vset.pattern.permute.xlu0 %v542_v0  ;;  %v418_v5 = vld [vmem:[#allocation7 + $0x4] ss:$16 sps:$4 sm:$0xff]   ;;  %v420_v6 = vld [vmem:[#allocation7 + $0xc] ss:$16 sps:$4 sm:$0xff]   ;;  %v422_v7 = vld [vmem:[#allocation7] ss:$16 sps:$4 sm:$0xff]  }
  0x2b   :  { %148 = vmatprep.subr.bf16.mxu0 %v412_v1  ;;  %191 = vmatprep.subr.bf16.mxu1 %v414_v2  ;;  %v423_v8 = vld [vmem:[#allocation7 + $0x8] ss:$16 sps:$4 sm:$0xff]   ;;  %vm132_vm0 = vcmask 261120   ;;  %vm226_vm1 = vcmask 7168   ;;  %v543_v10 = vmov -inf   ;;  %v68_v12 = vshrl.u32 %v67_v11, 7 }
  0x2c   :  { %149 = vmatpush1.bf16.msra.mxu0 %v416_v3  ;;  %192 = vmatpush1.bf16.msra.mxu1 %v417_v4  ;;  %227 = vst.msk [vmem:[#allocation2] sm:$0xff] %vm226_vm1, %v543_v10  ;;  %228 = vst.msk [vmem:[#allocation2 + $0x8] sm:$0xff] %vm226_vm1, %v543_v10  ;;  %v65_v15 = vld [vmem:[#allocation9] sm:$0xf]  ;;  %v544_v44 = vmov 0.0   ;;  %s545_s0 = smov [#allocation10]  }
  0x2d   :  { %150 = vmatprep.subr.bf16.mxu0 %v418_v5  ;;  %193 = vmatprep.subr.bf16.mxu1 %v420_v6  ;;  %v69_v13 = vsub.s32 0, %v68_v12  ;;  %v77_v14 = vsub.s32 2, %v68_v12  ;;  %v73_v16 = vsub.s32 1, %v68_v12  ;;  %v81_v17 = vsub.s32 3, %v68_v12  ;;  %229 = vst.msk [vmem:[#allocation3] sm:$0xff] %vm226_vm1, %v544_v44  ;;  %230 = vst.msk [vmem:[#allocation3 + $0x8] sm:$0xff] %vm226_vm1, %v544_v44 }
  0x2e   :  { %s371_s2 = sshll.u32 %s545_s0, 4  ;;  %s372_s2 = int_to_ptr.vmem [resolvable:$true] %s371_s2 }
  0x2f   :  { %v70_v18 = vrot.slane %v65_v15, %v69_v13  ;;  %v78_v19 = vrot.slane %v65_v15, %v77_v14  ;;  %v74_v20 = vrot.slane %v65_v15, %v73_v16  ;;  %v82_v21 = vrot.slane %v65_v15, %v81_v17  ;;  %s509_s30 = scalar_lea.vmem %s372_s2, 1024  ;;  %p514_p2 = scmp.lt.s32.totalorder %s372_s2, %s372_s2 }
  0x30   :  { %151 = vmatpush1.bf16.msra.mxu0 %v422_v7  ;;  %194 = vmatpush1.bf16.msra.mxu1 %v423_v8  ;;  %p510_p1 = scmp.ne.s32.totalorder %s372_s2, %s509_s30  ;;  %p515_p3 = scmp.lt.s32.totalorder %s509_s30, %s509_s30 }
  0x32   :  { %p516_p4 = por %p515_p3, %p514_p2 }
  0x33   :  { %395 = vmatmul.mubr.msk.bf16.vlgmr.msra.gmra.mxu0 %vm132_vm0, %v424_v9  ;;  %396 = vmatmul.mubr.msk.bf16.vlgmr.msra.gmra.mxu1 %vm132_vm0, %v424_v9  ;;  %v231_v45 = vld [vmem:[#allocation2] sm:$0xff]  ;;  %v232_v48 = vld [vmem:[#allocation2 + $0x8] sm:$0xff] }
  0x34   :  { %p517_p5 = pnand %p516_p4, %p510_p1 }
  0xf3   :  { %v170_v22 = vpop.f32.mrf.mxu0  ;;  %v213_v23 = vpop.f32.mrf.mxu1 }
  0xf4   :  { %v579_v24 = vadd.f32 %v170_v22, %v70_v18  ;;  %v581_v25 = vadd.f32 %v213_v23, %v78_v19 }
  0xf5   :  { %v172_v26 = vpop.f32.mrf.mxu0  ;;  %v215_v27 = vpop.f32.mrf.mxu1 }
  0xf6   :  { %v583_v28 = vadd.f32 %v172_v26, %v74_v20  ;;  %v585_v29 = vadd.f32 %v215_v27, %v82_v21  ;;  %v233_v34 = vmax.f32 %v579_v24, %v581_v25  ;;  %v245_v26 = vld [vmem:[#allocation3] sm:$0xff] }
  0xf7   :  { %v174_v30 = vpop.f32.mrf.mxu0  ;;  %v217_v31 = vpop.f32.mrf.mxu1 }
  0xf8   :  { %v587_v32 = vadd.f32 %v174_v30, %v70_v18  ;;  %v589_v33 = vadd.f32 %v217_v31, %v78_v19  ;;  %v234_v35 = vmax.f32 %v583_v28, %v585_v29 }
  0xf9   :  { %v176_v36 = vpop.f32.mrf.mxu0  ;;  %v219_v37 = vpop.f32.mrf.mxu1 }
  0xfa   :  { %v595_v38 = vadd.f32 %v176_v36, %v74_v20  ;;  %v597_v39 = vadd.f32 %v219_v37, %v82_v21  ;;  %v235_v40 = vmax.f32 %v233_v34, %v234_v35  ;;  %v238_v41 = vmax.f32 %v587_v32, %v589_v33  ;;  %v246_v34 = vld [vmem:[#allocation3 + $0x8] sm:$0xff] }
  0xfc   :  { %236 = vmax.xlane.f32.xlu0 %v235_v40  ;;  %v239_v42 = vmax.f32 %v595_v38, %v597_v39 }
  0xfe   :  { %v240_v43 = vmax.f32 %v238_v41, %v239_v42 }
 0x100   :  { %241 = vmax.xlane.f32.xlu0 %v240_v43 }
 0x185   :  { %v237_v46 = vpop.xlane.xlu0 %236 }
 0x186   :  { %v243_v47 = vmax.f32 %v231_v45, %v237_v46 }
 0x188   :  { %v247_v49 = vsub.f32 %v231_v45, %v243_v47  ;;  %304 = vst.msk [vmem:[#allocation2] sm:$0xff] %vm226_vm1, %v243_v47  ;;  %257 = vperm.xlu1 %410, %v243_v47  }
 0x189   :  { %v242_v50 = vpop.xlane.xlu0 %241 }
 0x18a   :  { %v244_v51 = vmax.f32 %v232_v48, %v242_v50  ;;  %v249_v21 = vmul.f32 1.442695, %v247_v49 }
 0x18c   :  { %v248_v52 = vsub.f32 %v232_v48, %v244_v51  ;;  %305 = vst.msk [vmem:[#allocation2 + $0x8] sm:$0xff] %vm226_vm1, %v244_v51  ;;  %262 = vperm.xlu1 %410, %v244_v51  }
 0x18e   :  { %v251_v22 = vmul.f32 1.442695, %v248_v52 }
 0x18f   :  { %v322_v45 = vld [vmem:[#allocation2] sm:$0xff] }
 0x193   :  { %v323_v49 = vld [vmem:[#allocation2 + $0x8] sm:$0xff] }
 0x203   :  { %v258_v53 = vpop.permute.xlu1 %257 }
 0x204   :  { %v265_v54 = vsub.f32 %v579_v24, %v258_v53  ;;  %v266_v55 = vsub.f32 %v583_v28, %v258_v53  ;;  %v267_v56 = vsub.f32 %v581_v25, %v258_v53  ;;  %v268_v57 = vsub.f32 %v585_v29, %v258_v53 }
 0x206   :  { %v273_v58 = vmul.f32 1.442695, %v265_v54  ;;  %v275_v59 = vmul.f32 1.442695, %v266_v55  ;;  %v277_v60 = vmul.f32 1.442695, %v267_v56 }
 0x207   :  { %v279_v61 = vmul.f32 1.442695, %v268_v57  ;;  %v263_v62 = vpop.permute.xlu1 %262 }
 0x208   :  { %425 = vpow2.f32 %v273_v58  ;;  %v269_v63 = vsub.f32 %v587_v32, %v263_v62  ;;  %v270_v0 = vsub.f32 %v595_v38, %v263_v62  ;;  %v271_v1 = vsub.f32 %v589_v33, %v263_v62 }
 0x209   :  { %427 = vpow2.f32 %v275_v59  ;;  %v272_v2 = vsub.f32 %v597_v39, %v263_v62 }
 0x20a   :  { %429 = vpow2.f32 %v277_v60  ;;  %v281_v3 = vmul.f32 1.442695, %v269_v63  ;;  %v283_v4 = vmul.f32 1.442695, %v270_v0  ;;  %v285_v5 = vmul.f32 1.442695, %v271_v1 }
 0x20b   :  { %431 = vpow2.f32 %v279_v61  ;;  %v287_v6 = vmul.f32 1.442695, %v272_v2 }
 0x20c   :  { %433 = vpow2.f32 %v281_v3 }
 0x20d   :  { %435 = vpow2.f32 %v283_v4 }
 0x20e   :  { %437 = vpow2.f32 %v285_v5 }
 0x20f   :  { %439 = vpow2.f32 %v287_v6 }
 0x210   :  { %441 = vpow2.f32 %v249_v21 }
 0x211   :  { %443 = vpow2.f32 %v251_v22 }
 0x215   :  { %v426_v7 = vpop.eup %425 }
 0x216   :  { %v428_v8 = vpop.eup %427 }
 0x217   :  { %v430_v9 = vpop.eup %429  ;;  %v289_v10 = vadd.f32 %v428_v8, %v426_v7 }
 0x218   :  { %v432_v11 = vpop.eup %431 }
 0x219   :  { %v434_v12 = vpop.eup %433  ;;  %v290_v13 = vadd.f32 %v430_v9, %v289_v10 }
 0x21a   :  { %v436_v14 = vpop.eup %435 }
 0x21b   :  { %v291_v15 = vadd.f32 %v432_v11, %v290_v13  ;;  %v294_v16 = vadd.f32 %v436_v14, %v434_v12  ;;  %v438_v17 = vpop.eup %437 }
 0x21c   :  { %v440_v19 = vpop.eup %439 }
 0x21d   :  { %292 = vadd.xlane.f32.xlu0 %v291_v15  ;;  %v295_v18 = vadd.f32 %v438_v17, %v294_v16  ;;  %v442_v23 = vpop.eup %441 }
 0x21e   :  { %v253_v27 = vmul.f32 %v442_v23, %v245_v26  ;;  %v444_v30 = vpop.eup %443 }
 0x21f   :  { %v296_v20 = vadd.f32 %v440_v19, %v295_v18  ;;  %v254_v36 = vmul.f32 %v444_v30, %v246_v34 }
 0x221   :  { %297 = vadd.xlane.f32.xlu1 %v296_v20 }
 0x2a6   :  { %v293_v31 = vpop.xlane.xlu0 %292 }
 0x2a7   :  { %v299_v35 = vadd.f32 %v293_v31, %v253_v27 }
 0x2a9   :  { %302 = vst.msk [vmem:[#allocation3] sm:$0xff] %vm226_vm1, %v299_v35 }
 0x2aa   :  { %v298_v37 = vpop.xlane.xlu1 %297 }
 0x2ab   :  { %v300_v40 = vadd.f32 %v298_v37, %v254_v36 }
 0x2ad   :  { %303 = vst.msk [vmem:[#allocation3 + $0x8] sm:$0xff] %vm226_vm1, %v300_v40 }
 0x2b0   :  { %v324_v41 = vld [vmem:[#allocation3] sm:$0xff] }
 0x2b1   :  { %445 = vlog2.f32 %v324_v41 }
 0x2b4   :  { %v325_v42 = vld [vmem:[#allocation3 + $0x8] sm:$0xff] }
 0x2b5   :  { %447 = vlog2.f32 %v325_v42 }
 0x2be   :  { %v446_v43 = vpop.eup %445 }
 0x2bf   :  { %v327_v44 = vmul.f32 0.6931472, %v446_v43 }
 0x2c1   :  { %v330_v46 = vadd.f32 %v327_v44, %v322_v45 }
 0x2c2   :  { %v448_v47 = vpop.eup %447 }
 0x2c3   :  { %342 = vperm.xlu0 %411, %v330_v46   ;;  %v329_v48 = vmul.f32 0.6931472, %v448_v47 }
 0x2c5   :  { %v331_v50 = vadd.f32 %v329_v48, %v323_v49 }
 0x2c7   :  { %347 = vperm.xlu1 %410, %v331_v50  }
 0x33e   :  { %v343_v51 = vpop.permute.xlu0 %342 }
 0x33f   :  { %v350_v52 = vsub.f32 %v579_v24, %v343_v51  ;;  %v351_v53 = vsub.f32 %v583_v28, %v343_v51  ;;  %v352_v54 = vsub.f32 %v581_v25, %v343_v51  ;;  %v353_v55 = vsub.f32 %v585_v29, %v343_v51 }
 0x341   :  { %358 = vst [vmem:[#allocation10] sm:$0xff] %v350_v52  ;;  %359 = vst [vmem:[#allocation10 + $0x8] sm:$0xff] %v351_v53 }
 0x342   :  { %360 = vst [vmem:[#allocation10 + $0x10] sm:$0xff] %v352_v54  ;;  %361 = vst [vmem:[#allocation10 + $0x18] sm:$0xff] %v353_v55  ;;  %v348_v56 = vpop.permute.xlu1 %347 }
 0x343   :  { %v354_v57 = vsub.f32 %v587_v32, %v348_v56  ;;  %v355_v58 = vsub.f32 %v595_v38, %v348_v56  ;;  %v356_v59 = vsub.f32 %v589_v33, %v348_v56  ;;  %v357_v24 = vsub.f32 %v597_v39, %v348_v56 }
 0x345   :  { %362 = vst [vmem:[#allocation10 + $0x20] sm:$0xff] %v354_v57  ;;  %363 = vst [vmem:[#allocation10 + $0x28] sm:$0xff] %v355_v58 }
 0x346   :  { %364 = vst [vmem:[#allocation10 + $0x30] sm:$0xff] %v356_v59  ;;  %365 = vst [vmem:[#allocation10 + $0x38] sm:$0xff] %v357_v24 }
 0x347   :  { %520 = shalt.err (!%p517_p5)
}
 0x348   :  { %s546_s4 = smov 512   ;;  %s547_s5 = smov 32  }
 0x349   :  { %377 = dma.vmem_to_hbm [thread:$0]  %s372_s2, 1024, %s631_s3, [#allocation6], %s546_s4, %s546_s4, %s547_s5  }
 0x34a   :  { %533 = dma.done.wait [#allocation6], 1024  }
 0x34b   :  { %534 = vsyncadd [#allocation6], 4294966272 }
 0x34c   :  { %381 = vsyncpa [#allocation5], 1 }
 0x34d   :  { %382 = vsyncpa [#allocation8], 1 }
 0x34e   :  { %383 = vsyncpa [#allocation6], 1 }

</bundles_post_ra>
